<compile_context>
chip_gen: v5e
topology: v5e:2x2
jax: 0.10.0
libtpu: 0.0.40
codegen_flags: <defaults>
</compile_context>

<pallas_src>
import math

import jax
import jax.numpy as jnp
from jax.experimental import pallas as pl
from jax.experimental.pallas import tpu as pltpu


def _round_up(x, m):
    return ((x + m - 1) // m) * m


def _sublane_multiple(dtype):
    # f32 -> 8, bf16 -> 16, int8/fp8 -> 32 sublane packing.
    return {4: 8, 2: 16, 1: 32}.get(jnp.dtype(dtype).itemsize, 8)


# ---------------------------------------------------------------------------
# Kernel bodies
# ---------------------------------------------------------------------------
def _lwc_tiled_kernel(x_ref, w_ref, b_ref, o_ref, acc_ref):
    """One (TM, TN) output tile of one channel; accumulate over the K grid axis."""
    # x_ref: (TM, TK), w_ref: (TK, TN), b_ref: (1, TN), o_ref: (TM, TN)
    k = pl.program_id(3)

    @pl.when(k == 0)
    def _init():
        acc_ref[...] = jnp.zeros_like(acc_ref)

    acc_ref[...] += jnp.dot(x_ref[...], w_ref[...],
                            preferred_element_type=jnp.float32)

    @pl.when(k == pl.num_programs(3) - 1)
    def _finalize():
        out = acc_ref[...] + b_ref[...].astype(jnp.float32)
        o_ref[...] = out.astype(o_ref.dtype)


def _lwc_batched_kernel(x_ref, w_ref, b_ref, o_ref):
    """CB whole channels per grid step (tiny per-channel problems)."""
    # x_ref: (CB, Bp, Ip), w_ref: (CB, Ip, Op), b_ref: (CB, 1, Op), o_ref: (CB, Bp, Op)
    acc = jax.lax.dot_general(
        x_ref[...], w_ref[...],
        dimension_numbers=(((2,), (1,)), ((0,), (0,))),
        preferred_element_type=jnp.float32)
    o_ref[...] = (acc + b_ref[...].astype(jnp.float32)).astype(o_ref.dtype)


# ---------------------------------------------------------------------------
# Wrapper
# ---------------------------------------------------------------------------
def linear_with_channel(x, w, b, *, tm=256, tn=256, tk=512,
                        max_channel_block=None):
    """x: (C, B, I), w: (C, I, O), b: (C, 1, O)  ->  (C, B, O)."""
    C, B, I = x.shape
    Cw, Iw, O = w.shape
    assert (Cw, Iw) == (C, I) and b.shape == (C, 1, O)

    out_dtype = x.dtype
    itemsize = jnp.dtype(x.dtype).itemsize
    sub = _sublane_multiple(x.dtype)

    # Minimum legal (sublane, lane) padded extents.
    bp_full = _round_up(B, sub)     # sublane dim of x / out
    ip_full = _round_up(I, 128)     # lane dim of x, sublane dim of w
    op_full = _round_up(O, 128)     # lane dim of w / b / out (lane-dense stores)

    flops = 2 * C * B * I * O

    # ----- batched path: whole channel fits in a single tile ------------------
    if bp_full <= tm and ip_full <= tk and op_full <= tn:
        per_ch_bytes = (bp_full * ip_full + ip_full * op_full
                        + bp_full * op_full + op_full) * itemsize
        budget = 4 << 20   # keep double-buffered blocks small on all gens (v7x: 64 MiB VMEM)
        cb = max(1, min(C, budget // max(per_ch_bytes, 1)))
        if max_channel_block is not None:
            cb = max(1, min(cb, max_channel_block))
        Cp = _round_up(C, cb)

        x_p = jnp.pad(x, ((0, Cp - C), (0, bp_full - B), (0, ip_full - I)))
        w_p = jnp.pad(w, ((0, Cp - C), (0, ip_full - I), (0, op_full - O)))
        b_p = jnp.pad(b, ((0, Cp - C), (0, 0), (0, op_full - O)))

        bytes_accessed = (x_p.size + w_p.size + b_p.size
                          + Cp * bp_full * op_full) * itemsize

        out = pl.pallas_call(
            _lwc_batched_kernel,
            out_shape=jax.ShapeDtypeStruct((Cp, bp_full, op_full), out_dtype),
            grid_spec=pltpu.PrefetchScalarGridSpec(
                num_scalar_prefetch=0,
                grid=(Cp // cb,),
                in_specs=[
                    pl.BlockSpec((cb, bp_full, ip_full), lambda c: (c, 0, 0)),
                    pl.BlockSpec((cb, ip_full, op_full), lambda c: (c, 0, 0)),
                    pl.BlockSpec((cb, 1, op_full), lambda c: (c, 0, 0)),
                ],
                out_specs=pl.BlockSpec((cb, bp_full, op_full),
                                       lambda c: (c, 0, 0)),
            ),
            compiler_params=pltpu.CompilerParams(
                dimension_semantics=("parallel",)),
            cost_estimate=pl.CostEstimate(
                flops=flops, transcendentals=0,
                bytes_accessed=bytes_accessed),
        )(x_p, w_p, b_p)
        return out[:C, :B, :O]

    # ----- tiled path: B / O / K tiling with f32 accumulator ------------------
    TM = _round_up(min(tm, bp_full), sub)
    TN = _round_up(min(tn, op_full), 128)
    TK = _round_up(min(tk, ip_full), 128)
    Bp = _round_up(B, TM)
    Op = _round_up(O, TN)
    Ip = _round_up(I, TK)

    x_p = jnp.pad(x, ((0, 0), (0, Bp - B), (0, Ip - I)))
    w_p = jnp.pad(w, ((0, 0), (0, Ip - I), (0, Op - O)))
    b_p = jnp.pad(b, ((0, 0), (0, 0), (0, Op - O)))

    bytes_accessed = (x_p.size + w_p.size + b_p.size + C * Bp * Op) * itemsize

    grid = (C, Bp // TM, Op // TN, Ip // TK)

    out = pl.pallas_call(
        _lwc_tiled_kernel,
        out_shape=jax.ShapeDtypeStruct((C, Bp, Op), out_dtype),
        grid_spec=pltpu.PrefetchScalarGridSpec(
            num_scalar_prefetch=0,
            grid=grid,
            in_specs=[
                pl.BlockSpec((pl.Squeezed(), TM, TK),
                             lambda c, m, n, k: (c, m, k)),
                pl.BlockSpec((pl.Squeezed(), TK, TN),
                             lambda c, m, n, k: (c, k, n)),
                pl.BlockSpec((pl.Squeezed(), 1, TN),
                             lambda c, m, n, k: (c, 0, n)),
            ],
            out_specs=pl.BlockSpec((pl.Squeezed(), TM, TN),
                                   lambda c, m, n, k: (c, m, n)),
            scratch_shapes=[pltpu.VMEM((TM, TN), jnp.float32)],
        ),
        compiler_params=pltpu.CompilerParams(
            dimension_semantics=("parallel", "parallel", "parallel",
                                 "arbitrary")),
        cost_estimate=pl.CostEstimate(
            flops=flops, transcendentals=0, bytes_accessed=bytes_accessed),
    )(x_p, w_p, b_p)
    return out[:C, :B, :O]


# ---------------------------------------------------------------------------
# Parameter init matching the PyTorch module's reset_parameters
# ---------------------------------------------------------------------------
def init_params(key, channel_size, input_size, output_size, dtype=jnp.float32):
    kw, kb = jax.random.split(key)
    # kaiming_uniform_(w, a=sqrt(3)): gain = sqrt(2/(1+a^2)) = sqrt(0.5)
    # fan_in for a 3D tensor (C, I, O) = size(1) * prod(sizes[2:]) = I * O
    fan_in = input_size * output_size
    gain = math.sqrt(2.0 / (1.0 + 3.0))
    bound_w = gain * math.sqrt(3.0 / fan_in)
    w = jax.random.uniform(
        kw, (channel_size, input_size, output_size), dtype,
        minval=-bound_w, maxval=bound_w)
    bound_b = 1.0 / math.sqrt(fan_in)
    b = jax.random.uniform(
        kb, (channel_size, 1, output_size), dtype,
        minval=-bound_b, maxval=bound_b)
    return w, b


if __name__ == "__main__":
    key = jax.random.PRNGKey(0)
    kx, kp, k2 = jax.random.split(key, 3)

    # Case 1: tiny shapes -> channel-batched path (all channels in one grid step).
    C, B, I, O = 4, 8, 32, 16
    x = jax.random.normal(kx, (C, B, I), jnp.float32)
    w, b = init_params(kp, C, I, O)
    out = jax.block_until_ready(linear_with_channel(x, w, b))
    ref = jnp.einsum("cbi,cio->cbo", x, w,
                     precision=jax.lax.Precision.HIGHEST) + b
    assert out.shape == (C, B, O)
    assert jnp.allclose(out, ref, atol=1e-5, rtol=1e-5)

    # Case 2: forces the tiled path (B/O/K tiling, f32 accumulator, O padding).
    C2, B2, I2, O2 = 2, 24, 256, 160
    kx2, kp2 = jax.random.split(k2)
    x2 = jax.random.normal(kx2, (C2, B2, I2), jnp.float32)
    w2, b2 = init_params(kp2, C2, I2, O2)
    out2 = jax.block_until_ready(
        linear_with_channel(x2, w2, b2, tm=8, tn=128, tk=128))
    ref2 = jnp.einsum("cbi,cio->cbo", x2, w2,
                      precision=jax.lax.Precision.HIGHEST) + b2
    assert out2.shape == (C2, B2, O2)
    assert jnp.allclose(out2, ref2, atol=1e-4, rtol=1e-4)

    print("KERNEL_OK")
</pallas_src>

<mosaic_0001>
module attributes {stable_mosaic.version = 11 : i64} {
  func.func @_lwc_batched_kernel(%arg0: i32, %arg1: memref<4x8x128xf32, #tpu.memory_space<vmem>>, %arg2: memref<4x128x128xf32, #tpu.memory_space<vmem>>, %arg3: memref<4x1x128xf32, #tpu.memory_space<vmem>>, %arg4: memref<4x8x128xf32, #tpu.memory_space<vmem>>) attributes {dimension_semantics = [#tpu.dimension_semantics<parallel>], iteration_bounds = array<i64: 1>, scalar_prefetch = 0 : i64, scratch_operands = 0 : i64, tpu.core_type = #tpu.core_type<tc>, window_params = [{transform_indices = @transform_0, window_bounds = array<i64: 4, 8, 128>}, {transform_indices = @transform_1, window_bounds = array<i64: 4, 128, 128>}, {transform_indices = @transform_2, window_bounds = array<i64: 4, 1, 128>}, {transform_indices = @transform_3, window_bounds = array<i64: 4, 8, 128>}]} {
    %c0 = arith.constant 0 : index
    %c0_0 = arith.constant 0 : index
    %c0_1 = arith.constant 0 : index
    %0 = vector.load %arg1[%c0, %c0_0, %c0_1] : memref<4x8x128xf32, #tpu.memory_space<vmem>>, vector<4x8x128xf32>
    %c0_2 = arith.constant 0 : index
    %c0_3 = arith.constant 0 : index
    %c0_4 = arith.constant 0 : index
    %1 = vector.load %arg2[%c0_2, %c0_3, %c0_4] : memref<4x128x128xf32, #tpu.memory_space<vmem>>, vector<4x128x128xf32>
    %cst = arith.constant dense<0.000000e+00> : vector<4x8x128xf32>
    %2 = tpu.matmul %0, %1, %cst {dimension_numbers = #tpu.dot_dimension_numbers<[2], [1], [1], [2], [0, 0, 0, 1, 1, 2], [0], [0]>} : vector<4x8x128xf32>, vector<4x128x128xf32>, vector<4x8x128xf32> -> vector<4x8x128xf32>
    %c0_5 = arith.constant 0 : index
    %c0_6 = arith.constant 0 : index
    %c0_7 = arith.constant 0 : index
    %3 = vector.load %arg3[%c0_5, %c0_6, %c0_7] : memref<4x1x128xf32, #tpu.memory_space<vmem>>, vector<4x1x128xf32>
    %4 = vector.broadcast %3 : vector<4x1x128xf32> to vector<4x8x128xf32>
    %5 = arith.addf %2, %4 : vector<4x8x128xf32>
    %c0_8 = arith.constant 0 : index
    %c0_9 = arith.constant 0 : index
    %c0_10 = arith.constant 0 : index
    %6 = vector.load %arg4[%c0_8, %c0_9, %c0_10] : memref<4x8x128xf32, #tpu.memory_space<vmem>>, vector<4x8x128xf32>
    tpu.vector_store %arg4[%c0_8, %c0_9, %c0_10], %5 {strides = array<i32>} : memref<4x8x128xf32, #tpu.memory_space<vmem>>, vector<4x8x128xf32>,
    return
  }
  func.func @transform_0(%arg0: i32) -> (i32, i32, i32) {
    %c0_i32 = arith.constant 0 : i32
    %c0_i32_0 = arith.constant 0 : i32
    %c0_i32_1 = arith.constant 0 : i32
    return %arg0, %c0_i32, %c0_i32_0 : i32, i32, i32
  }
  func.func @transform_1(%arg0: i32) -> (i32, i32, i32) {
    %c0_i32 = arith.constant 0 : i32
    %c0_i32_0 = arith.constant 0 : i32
    %c0_i32_1 = arith.constant 0 : i32
    return %arg0, %c0_i32, %c0_i32_0 : i32, i32, i32
  }
  func.func @transform_2(%arg0: i32) -> (i32, i32, i32) {
    %c0_i32 = arith.constant 0 : i32
    %c0_i32_0 = arith.constant 0 : i32
    %c0_i32_1 = arith.constant 0 : i32
    return %arg0, %c0_i32, %c0_i32_0 : i32, i32, i32
  }
  func.func @transform_3(%arg0: i32) -> (i32, i32, i32) {
    %c0_i32 = arith.constant 0 : i32
    %c0_i32_0 = arith.constant 0 : i32
    %c0_i32_1 = arith.constant 0 : i32
    return %arg0, %c0_i32, %c0_i32_0 : i32, i32, i32
  }
}

</mosaic_0001>

<bundles_post_ra>
// kernel: tpu_custom_call.1
= control target key start
LH: loop header
LB: loop body
LE: loop exit
PB: predicated region body
PF: predicated region fallthrough
CT: control target
= control target key end

     0   :  { %8 = vsyncpa [#allocation3], 0  ;;  %s413_s0 = inlined_call_operand.hbm [shape: f32[4,8,128], index: 0, kind: input, shape index: {}]   ;;  %s414_s1 = inlined_call_operand.hbm [shape: f32[4,128,128], index: 1, kind: input, shape index: {}]   ;;  %s415_s2 = inlined_call_operand.hbm [shape: f32[4,1,128], index: 2, kind: input, shape index: {}]   ;;  %s416_s3 = inlined_call_operand.hbm [shape: f32[4,8,128], index: 3, kind: output, shape index: {}]  }
   0x1   :  { %9 = vsyncpa [#allocation6], 0 }
   0x2   :  { %10 = vsyncpa [#allocation4], 0  ;;  %s28_s14 = sshll.u32 %s414_s1, 4  ;;  %s364_s15 = smov [#allocation5]   ;;  %s29_s14 = int_to_ptr.hbm [resolvable:$true] %s28_s14 }
   0x3   :  { %s30_s16 = sshll.u32 %s364_s15, 4  ;;  %s15_s19 = sshll.u32 %s413_s0, 4  ;;  %s31_s16 = int_to_ptr.vmem [resolvable:$true] %s30_s16  ;;  %s16_s19 = int_to_ptr.hbm [resolvable:$true] %s15_s19 }
   0x4   :  { %s365_s20 = smov 128   ;;  %s366_s21 = smov 8  }
   0x5   :  { %36 = dma.hbm_to_vmem [thread:$0]  %s29_s14, 8192, %s31_s16, [#allocation6], %s365_s20, %s365_s20, %s366_s21  }
   0x6   :  { %s367_s22 = smov [#allocation2]   ;;  %s41_s1 = sshll.u32 %s415_s2, 4  ;;  %s42_s1 = int_to_ptr.hbm [resolvable:$true] %s41_s1 }
   0x7   :  { %s17_s23 = sshll.u32 %s367_s22, 4  ;;  %s368_s0 = smov [#allocation7]   ;;  %s18_s23 = int_to_ptr.vmem [resolvable:$true] %s17_s23 }
   0x8   :  { %23 = dma.hbm_to_vmem [thread:$0]  %s16_s19, 512, %s18_s23, [#allocation3], %s365_s20, %s365_s20, %s366_s21  }
   0x9   :  { %s43_s26 = sshll.u32 %s368_s0, 4  ;;  %s369_s27 = smov 16   ;;  %s44_s26 = int_to_ptr.vmem [resolvable:$true] %s43_s26 }
   0xa   :  { %s370_s28 = smov 1  }
   0xb   :  { %49 = dma.hbm_to_vmem [thread:$0]  %s42_s1, 64, %s44_s26, [#allocation6], %s369_s27, %s369_s27, %s370_s28  }
   0xc   :  { %358 = dma.done.wait [#allocation3], 512  }
   0xd   :  { %359 = vsyncadd [#allocation3], 4294966784 }
   0xe   :  { %360 = dma.done.wait [#allocation6], 8256  }
   0xf   :  { %361 = vsyncadd [#allocation6], 4294959040  ;;  %v113_v0 = vld [vmem:[#allocation5 + $0x178] sm:$0xff]  ;;  %v112_v2 = vld [vmem:[#allocation5 + $0x170] sm:$0xff]  ;;  %s371_s2 = smov [#allocation8]   ;;  %s236_s5 = sshll.u32 %s416_s3, 4  ;;  %s237_s5 = int_to_ptr.hbm [resolvable:$true] %s236_s5 }
  0x10   :  { %v129_v1 = vld [vmem:[#allocation5 + $0x1f8] sm:$0xff]  ;;  %186 = vmatpush.msra.mxu2 %v113_v0  ;;  %v128_v3 = vld [vmem:[#allocation5 + $0x1f0] sm:$0xff]  ;;  %v111_v4 = vld [vmem:[#allocation5 + $0x168] sm:$0xff]  ;;  %s234_s29 = sshll.u32 %s371_s2, 4  ;;  %s235_s29 = int_to_ptr.vmem [resolvable:$true] %s234_s29 }
  0x11   :  { %206 = vmatpush.msra.mxu3 %v129_v1  ;;  %v127_v5 = vld [vmem:[#allocation5 + $0x1e8] sm:$0xff]  ;;  %v81_v6 = vld [vmem:[#allocation5 + $0x78] sm:$0xff]  ;;  %v80_v8 = vld [vmem:[#allocation5 + $0x70] sm:$0xff] }
  0x12   :  { %v97_v7 = vld [vmem:[#allocation5 + $0xf8] sm:$0xff]  ;;  %187 = vmatpush.msra.mxu2 %v112_v2  ;;  %v96_v9 = vld [vmem:[#allocation5 + $0xf0] sm:$0xff]  ;;  %146 = vmatpush.msra.mxu0 %v81_v6  ;;  %v110_v10 = vld [vmem:[#allocation5 + $0x160] sm:$0xff] }
  0x13   :  { %207 = vmatpush.msra.mxu3 %v128_v3  ;;  %166 = vmatpush.msra.mxu1 %v97_v7  ;;  %v126_v11 = vld [vmem:[#allocation5 + $0x1e0] sm:$0xff]  ;;  %v79_v12 = vld [vmem:[#allocation5 + $0x68] sm:$0xff]  ;;  %v109_v14 = vld [vmem:[#allocation5 + $0x158] sm:$0xff] }
  0x14   :  { %188 = vmatpush.msra.mxu2 %v111_v4  ;;  %v95_v13 = vld [vmem:[#allocation5 + $0xe8] sm:$0xff]  ;;  %147 = vmatpush.msra.mxu0 %v80_v8  ;;  %v125_v15 = vld [vmem:[#allocation5 + $0x1d8] sm:$0xff]  ;;  %v78_v16 = vld [vmem:[#allocation5 + $0x60] sm:$0xff] }
  0x15   :  { %208 = vmatpush.msra.mxu3 %v127_v5  ;;  %167 = vmatpush.msra.mxu1 %v96_v9  ;;  %v94_v17 = vld [vmem:[#allocation5 + $0xe0] sm:$0xff]  ;;  %v108_v18 = vld [vmem:[#allocation5 + $0x150] sm:$0xff]  ;;  %v77_v20 = vld [vmem:[#allocation5 + $0x58] sm:$0xff] }
  0x16   :  { %189 = vmatpush.msra.mxu2 %v110_v10  ;;  %148 = vmatpush.msra.mxu0 %v79_v12  ;;  %v124_v19 = vld [vmem:[#allocation5 + $0x1d0] sm:$0xff]  ;;  %v93_v21 = vld [vmem:[#allocation5 + $0xd8] sm:$0xff]  ;;  %v107_v22 = vld [vmem:[#allocation5 + $0x148] sm:$0xff] }
  0x17   :  { %209 = vmatpush.msra.mxu3 %v126_v11  ;;  %168 = vmatpush.msra.mxu1 %v95_v13  ;;  %v123_v23 = vld [vmem:[#allocation5 + $0x1c8] sm:$0xff]  ;;  %v76_v24 = vld [vmem:[#allocation5 + $0x50] sm:$0xff]  ;;  %v106_v26 = vld [vmem:[#allocation5 + $0x140] sm:$0xff] }
  0x18   :  { %190 = vmatpush.msra.mxu2 %v109_v14  ;;  %149 = vmatpush.msra.mxu0 %v78_v16  ;;  %v92_v25 = vld [vmem:[#allocation5 + $0xd0] sm:$0xff]  ;;  %v122_v27 = vld [vmem:[#allocation5 + $0x1c0] sm:$0xff]  ;;  %v75_v28 = vld [vmem:[#allocation5 + $0x48] sm:$0xff] }
  0x19   :  { %210 = vmatpush.msra.mxu3 %v125_v15  ;;  %169 = vmatpush.msra.mxu1 %v94_v17  ;;  %v91_v29 = vld [vmem:[#allocation5 + $0xc8] sm:$0xff]  ;;  %v105_v30 = vld [vmem:[#allocation5 + $0x138] sm:$0xff]  ;;  %v74_v32 = vld [vmem:[#allocation5 + $0x40] sm:$0xff] }
  0x1a   :  { %191 = vmatpush.msra.mxu2 %v108_v18  ;;  %150 = vmatpush.msra.mxu0 %v77_v20  ;;  %v121_v31 = vld [vmem:[#allocation5 + $0x1b8] sm:$0xff]  ;;  %v90_v33 = vld [vmem:[#allocation5 + $0xc0] sm:$0xff]  ;;  %v104_v34 = vld [vmem:[#allocation5 + $0x130] sm:$0xff] }
  0x1b   :  { %211 = vmatpush.msra.mxu3 %v124_v19  ;;  %170 = vmatpush.msra.mxu1 %v93_v21  ;;  %v120_v35 = vld [vmem:[#allocation5 + $0x1b0] sm:$0xff]  ;;  %v73_v36 = vld [vmem:[#allocation5 + $0x38] sm:$0xff]  ;;  %v103_v38 = vld [vmem:[#allocation5 + $0x128] sm:$0xff] }
  0x1c   :  { %192 = vmatpush.msra.mxu2 %v107_v22  ;;  %151 = vmatpush.msra.mxu0 %v76_v24  ;;  %v89_v37 = vld [vmem:[#allocation5 + $0xb8] sm:$0xff]  ;;  %v119_v39 = vld [vmem:[#allocation5 + $0x1a8] sm:$0xff]  ;;  %v72_v40 = vld [vmem:[#allocation5 + $0x30] sm:$0xff] }
  0x1d   :  { %212 = vmatpush.msra.mxu3 %v123_v23  ;;  %171 = vmatpush.msra.mxu1 %v92_v25  ;;  %v88_v41 = vld [vmem:[#allocation5 + $0xb0] sm:$0xff]  ;;  %v102_v42 = vld [vmem:[#allocation5 + $0x120] sm:$0xff]  ;;  %v101_v44 = vld [vmem:[#allocation5 + $0x118] sm:$0xff] }
  0x1e   :  { %193 = vmatpush.msra.mxu2 %v106_v26  ;;  %152 = vmatpush.msra.mxu0 %v75_v28  ;;  %v118_v43 = vld [vmem:[#allocation5 + $0x1a0] sm:$0xff]  ;;  %v71_v45 = vld [vmem:[#allocation5 + $0x28] sm:$0xff]  ;;  %v117_v47 = vld [vmem:[#allocation5 + $0x198] sm:$0xff] }
  0x1f   :  { %213 = vmatpush.msra.mxu3 %v122_v27  ;;  %172 = vmatpush.msra.mxu1 %v91_v29  ;;  %v87_v46 = vld [vmem:[#allocation5 + $0xa8] sm:$0xff]  ;;  %v70_v48 = vld [vmem:[#allocation5 + $0x20] sm:$0xff]  ;;  %v100_v50 = vld [vmem:[#allocation5 + $0x110] sm:$0xff] }
  0x20   :  { %194 = vmatpush.msra.mxu2 %v105_v30  ;;  %153 = vmatpush.msra.mxu0 %v74_v32  ;;  %v86_v49 = vld [vmem:[#allocation5 + $0xa0] sm:$0xff]  ;;  %v116_v51 = vld [vmem:[#allocation5 + $0x190] sm:$0xff]  ;;  %v69_v52 = vld [vmem:[#allocation5 + $0x18] sm:$0xff] }
  0x21   :  { %214 = vmatpush.msra.mxu3 %v121_v31  ;;  %173 = vmatpush.msra.mxu1 %v90_v33  ;;  %v85_v53 = vld [vmem:[#allocation5 + $0x98] sm:$0xff]  ;;  %v99_v54 = vld [vmem:[#allocation5 + $0x108] sm:$0xff]  ;;  %v68_v56 = vld [vmem:[#allocation5 + $0x10] sm:$0xff] }
  0x22   :  { %195 = vmatpush.msra.mxu2 %v104_v34  ;;  %154 = vmatpush.msra.mxu0 %v73_v36  ;;  %v115_v55 = vld [vmem:[#allocation5 + $0x188] sm:$0xff]  ;;  %v84_v57 = vld [vmem:[#allocation5 + $0x90] sm:$0xff]  ;;  %v98_v58 = vld [vmem:[#allocation5 + $0x100] sm:$0xff] }
  0x23   :  { %215 = vmatpush.msra.mxu3 %v120_v35  ;;  %174 = vmatpush.msra.mxu1 %v89_v37  ;;  %v114_v59 = vld [vmem:[#allocation5 + $0x180] sm:$0xff]  ;;  %v64_v60 = vld [vmem:[#allocation2 + $0x10] sm:$0xff]  ;;  %v65_v61 = vld [vmem:[#allocation2 + $0x18] sm:$0xff] }
  0x24   :  { %196 = vmatpush.msra.mxu2 %v103_v38  ;;  %155 = vmatpush.msra.mxu0 %v72_v40  ;;  %v67_v62 = vld [vmem:[#allocation5 + $0x8] sm:$0xff]  ;;  %v66_v0 = vld [vmem:[#allocation5] sm:$0xff] }
  0x25   :  { %216 = vmatpush.msra.mxu3 %v119_v39  ;;  %175 = vmatpush.msra.mxu1 %v88_v41  ;;  %v83_v63 = vld [vmem:[#allocation5 + $0x88] sm:$0xff]  ;;  %v82_v1 = vld [vmem:[#allocation5 + $0x80] sm:$0xff] }
  0x26   :  { %197 = vmatpush.msra.mxu2 %v102_v42  ;;  %156 = vmatpush.msra.mxu0 %v71_v45  ;;  %v62_v2 = vld [vmem:[#allocation2] sm:$0xff]  ;;  %v63_v3 = vld [vmem:[#allocation2 + $0x8] sm:$0xff] }
  0x27   :  { %217 = vmatpush.msra.mxu3 %v118_v43  ;;  %176 = vmatpush.msra.mxu1 %v87_v46  ;;  %v258_v4 = vld [vmem:[#allocation7] ss:$0 sm:$0xff]  ;;  %v259_v5 = vld [vmem:[#allocation7 + $0x1] ss:$0 sm:$0xff]  ;;  %v260_v6 = vld [vmem:[#allocation7 + $0x2] ss:$0 sm:$0xff] }
  0x28   :  { %198 = vmatpush.msra.mxu2 %v101_v44  ;;  %157 = vmatpush.msra.mxu0 %v70_v48  ;;  %v261_v7 = vld [vmem:[#allocation7 + $0x3] ss:$0 sm:$0xff] }
  0x29   :  { %218 = vmatpush.msra.mxu3 %v117_v47  ;;  %177 = vmatpush.msra.mxu1 %v86_v49 }
  0x2a   :  { %199 = vmatpush.msra.mxu2 %v100_v50  ;;  %158 = vmatpush.msra.mxu0 %v69_v52 }
  0x2b   :  { %219 = vmatpush.msra.mxu3 %v116_v51  ;;  %178 = vmatpush.msra.mxu1 %v85_v53 }
  0x2c   :  { %200 = vmatpush.msra.mxu2 %v99_v54  ;;  %159 = vmatpush.msra.mxu0 %v68_v56 }
  0x2d   :  { %220 = vmatpush.msra.mxu3 %v115_v55  ;;  %179 = vmatpush.msra.mxu1 %v84_v57 }
  0x2e   :  { %201 = vmatpush.msra.mxu2 %v98_v58  ;;  %160 = vmatpush.msra.mxu0 %v67_v62 }
  0x2f   :  { %221 = vmatpush.msra.mxu3 %v114_v59  ;;  %202 = vmatmul.f32.vlgmr.msra.gmra.mxu2 %v64_v60 }
  0x30   :  { %222 = vmatmul.f32.vlgmr.msra.gmra.mxu3 %v65_v61  ;;  %180 = vmatpush.msra.mxu1 %v83_v63 }
  0x31   :  { %161 = vmatpush.msra.mxu0 %v66_v0 }
  0x32   :  { %181 = vmatpush.msra.mxu1 %v82_v1  ;;  %162 = vmatmul.f32.vlgmr.msra.gmra.mxu0 %v62_v2 }
  0x33   :  { %182 = vmatmul.f32.vlgmr.msra.gmra.mxu1 %v63_v3 }
  0xaf   :  { %v163_v8 = vpop.f32.mrf.mxu0 }
  0xb0   :  { %v183_v9 = vpop.f32.mrf.mxu1  ;;  %v164_v10 = vadd.f32 %v258_v4, %v163_v8 }
  0xb1   :  { %v184_v11 = vadd.f32 %v259_v5, %v183_v9 }
  0xb2   :  { %v203_v12 = vpop.f32.mrf.mxu2  ;;  %226 = vst [vmem:[#allocation8] sm:$0xff] %v164_v10 }
  0xb3   :  { %v223_v13 = vpop.f32.mrf.mxu3  ;;  %v204_v14 = vadd.f32 %v260_v6, %v203_v12  ;;  %227 = vst [vmem:[#allocation8 + $0x8] sm:$0xff] %v184_v11 }
  0xb4   :  { %v224_v15 = vadd.f32 %v261_v7, %v223_v13 }
  0xb5   :  { %228 = vst [vmem:[#allocation8 + $0x10] sm:$0xff] %v204_v14 }
  0xb6   :  { %229 = vst [vmem:[#allocation8 + $0x18] sm:$0xff] %v224_v15 }
  0xb7   :  { %242 = dma.vmem_to_hbm [thread:$0]  %s235_s29, 512, %s237_s5, [#allocation4], %s365_s20, %s365_s20, %s366_s21  }
  0xb8   :  { %362 = dma.done.wait [#allocation4], 512  }
  0xb9   :  { %363 = vsyncadd [#allocation4], 4294966784 }
  0xba   :  { %247 = vsyncpa [#allocation3], 1 }
  0xbb   :  { %248 = vsyncpa [#allocation6], 1 }
  0xbc   :  { %249 = vsyncpa [#allocation4], 1 }

</bundles_post_ra>
